<compile_context>
chip_gen: v7x
topology: tpu7x:2x2x1
jax: 0.10.0
libtpu: 0.0.40
codegen_flags: <defaults>
</compile_context>

<pallas_src>
import functools
import math

import jax
import jax.numpy as jnp
from jax import lax
from jax.experimental import pallas as pl
from jax.experimental.pallas import tpu as pltpu


def _layer_norm(v, gamma, beta, eps):
    """LayerNorm over the last axis (biased variance, like torch.nn.LayerNorm)."""
    mu = jnp.mean(v, axis=-1, keepdims=True)
    c = v - mu
    var = jnp.mean(c * c, axis=-1, keepdims=True)
    return c * lax.rsqrt(var + eps) * gamma + beta


def _mha_block_kernel(x_ref, w_in_ref, b_in_ref, wo_ref, bo_ref,
                      g1_ref, be1_ref, wfc_ref, bfc_ref, g2_ref, be2_ref,
                      out_ref, *, num_heads, eps):
    """One batch tile per grid step; weights are whole-array VMEM residents."""
    BT, S, E = x_ref.shape
    H = num_heads
    Dh = E // H

    x = x_ref[...]                                # (BT, S, E) f32
    x2 = x.reshape(BT * S, E)                     # fold batch into matmul M dim

    # ---- packed QKV projection: one (BT*S, E) @ (E, 3E) bf16 matmul, f32 acc ----
    # (the 1/sqrt(Dh) q-scale is pre-folded into the Q columns of w_in / b_in)
    qkv = jnp.dot(x2.astype(jnp.bfloat16), w_in_ref[...],
                  preferred_element_type=jnp.float32) + b_in_ref[...]
    qkv = qkv.astype(jnp.bfloat16).reshape(BT, S, 3 * E)
    q = qkv[..., 0:E]
    k = qkv[..., E:2 * E]
    v = qkv[..., 2 * E:3 * E]

    # ---- per-head attention (leading-batch 3-D einsums), softmax in f32 ---------
    heads = []
    for h in range(H):                            # static, unrolled (H is small)
        sl = slice(h * Dh, (h + 1) * Dh)
        logits = jnp.einsum("bqd,bkd->bqk", q[..., sl], k[..., sl],
                            preferred_element_type=jnp.float32)       # (BT, S, S)
        p = jnp.exp(logits - logits.max(-1, keepdims=True))
        p = p * pl.reciprocal(p.sum(-1, keepdims=True), approx=True)  # EUP reciprocal
        heads.append(jnp.einsum("bqk,bkd->bqd", p.astype(jnp.bfloat16), v[..., sl],
                                preferred_element_type=jnp.float32))  # (BT, S, Dh)

    # reassemble heads once, then a single K=E output projection
    o = jnp.concatenate(heads, axis=-1).reshape(BT * S, E)            # (BT*S, E) f32
    attn = jnp.dot(o.astype(jnp.bfloat16), wo_ref[...],
                   preferred_element_type=jnp.float32) + bo_ref[...]

    # ---- residual + LayerNorm1 (f32) --------------------------------------------
    ln1 = _layer_norm(attn + x2, g1_ref[...], be1_ref[...], eps)

    # ---- fc + residual + LayerNorm2 (f32) ----------------------------------------
    f = jnp.dot(ln1.astype(jnp.bfloat16), wfc_ref[...],
                preferred_element_type=jnp.float32)
    ln2 = _layer_norm(f + bfc_ref[...] + ln1, g2_ref[...], be2_ref[...], eps)

    # single bulk lane-dense store
    out_ref[...] = ln2.reshape(BT, S, E).astype(out_ref.dtype)


def _pick_b_tile(B, S, target_rows=512):
    """Largest divisor of B with b_tile*S <= target_rows, keeping >=2 grid steps."""
    divisors = [d for d in range(1, B + 1) if B % d == 0]
    fits = [d for d in divisors if d * S <= target_rows]
    bt = max(fits) if fits else 1
    if B // bt < 2:                               # keep megacore sharding on the batch axis
        smaller = [d for d in divisors if d < bt and B // d >= 2]
        if smaller:
            bt = max(smaller)
    return bt


def _vmem_limit_bytes(S, E, b_tile, num_heads):
    f32, bf16 = 4, 2
    m = b_tile * S
    x_io = 2 * (m * E) * f32 * 2                   # x tile + out tile, double-buffered
    weights = 5 * E * E * bf16 + 8 * E * f32       # w_in (E,3E) + wo + wfc, biases/affines
    work = 3 * b_tile * S * S * f32 + 10 * m * E * f32
    est = x_io + weights + work + (2 << 20)
    return int(min(64 * 1024 * 1024, max(16 * 1024 * 1024, est)))


def mha_block_forward(x, params, *, num_heads, b_tile=None, eps=1e-5):
    """x: (S, B, E) float32 — seq-first, like nn.MultiheadAttention's default layout."""
    S, B, E = x.shape
    assert E % num_heads == 0, "embed_dim must be divisible by num_heads"
    if b_tile is None:
        b_tile = _pick_b_tile(B, S)
    assert B % b_tile == 0, "batch must be divisible by b_tile"

    # TODO(synk): keep the layout relayout in XLA for now — an in-kernel sublane
    # relayout transpose of the activation tile is not reliably lowered by Mosaic.
    xb = jnp.transpose(x, (1, 0, 2))              # (B, S, E): batch-major for the kernel

    # fold the 1/sqrt(Dh) q-scale into the packed projection, cast weights to bf16
    scale = 1.0 / math.sqrt(E // num_heads)
    w_in = (params["w_in"].at[:, :E].multiply(scale)).astype(jnp.bfloat16)
    b_in = params["b_in"].at[:E].multiply(scale)
    wo = params["wo"].astype(jnp.bfloat16)
    wfc = params["wfc"].astype(jnp.bfloat16)

    row = lambda v: v.reshape(1, -1)
    vspec = pl.BlockSpec(memory_space=pltpu.MemorySpace.VMEM)   # whole-array, single-buffered

    kernel = functools.partial(_mha_block_kernel, num_heads=num_heads, eps=eps)

    grid_spec = pltpu.PrefetchScalarGridSpec(
        num_scalar_prefetch=0,
        grid=(B // b_tile,),
        in_specs=[
            pl.BlockSpec((b_tile, S, E), lambda i: (i, 0, 0)),   # x tile (pipelined)
            vspec, vspec,                                        # packed QKV proj (bf16 W, f32 b)
            vspec, vspec,                                        # out proj
            vspec, vspec,                                        # LayerNorm1 affine
            vspec, vspec,                                        # fc
            vspec, vspec,                                        # LayerNorm2 affine
        ],
        out_specs=pl.BlockSpec((b_tile, S, E), lambda i: (i, 0, 0)),
    )

    yb = pl.pallas_call(
        kernel,
        out_shape=jax.ShapeDtypeStruct((B, S, E), jnp.float32),
        grid_spec=grid_spec,
        compiler_params=pltpu.CompilerParams(
            dimension_semantics=("parallel",),        # batch is embarrassingly parallel
            vmem_limit_bytes=_vmem_limit_bytes(S, E, b_tile, num_heads)),
    )(xb,
      w_in, row(b_in),
      wo, row(params["bo"]),
      row(params["g1"]), row(params["be1"]),
      wfc, row(params["bfc"]),
      row(params["g2"]), row(params["be2"]))

    return jnp.transpose(yb, (1, 0, 2))               # back to (S, B, E)


def init_params(key, embed_dim):
    """Deterministic synthetic parameters, stored (in, out) so the kernel computes x @ W."""
    E = embed_dim
    ks = jax.random.split(key, 10)
    r = lambda k, s: 0.1 * jax.random.normal(k, s, jnp.float32)
    return dict(
        w_in=r(ks[0], (E, 3 * E)), b_in=r(ks[1], (3 * E,)),   # packed Q|K|V proj
        wo=r(ks[2], (E, E)),       bo=r(ks[3], (E,)),         # attention out proj
        wfc=r(ks[4], (E, E)),      bfc=r(ks[5], (E,)),        # fc
        g1=1.0 + r(ks[6], (E,)),   be1=r(ks[7], (E,)),        # LayerNorm1 affine
        g2=1.0 + r(ks[8], (E,)),   be2=r(ks[9], (E,)),        # LayerNorm2 affine
    )


def ref_forward(x, p, *, num_heads, eps=1e-5):
    """Pure-JAX reference (float32, HIGHEST precision), same (S, B, E) layout."""
    S, B, E = x.shape
    Dh = E // num_heads
    hp = lax.Precision.HIGHEST
    xb = jnp.transpose(x, (1, 0, 2))                                  # (B, S, E)

    qkv = jnp.einsum("bse,ef->bsf", xb, p["w_in"], precision=hp) + p["b_in"]
    q, k, v = qkv[..., :E], qkv[..., E:2 * E], qkv[..., 2 * E:]
    heads = lambda t: t.reshape(B, S, num_heads, Dh).transpose(0, 2, 1, 3)
    q, k, v = heads(q) * (1.0 / math.sqrt(Dh)), heads(k), heads(v)

    a = jax.nn.softmax(jnp.einsum("bhqd,bhkd->bhqk", q, k, precision=hp), axis=-1)
    o = jnp.einsum("bhqk,bhkd->bhqd", a, v, precision=hp)
    o = o.transpose(0, 2, 1, 3).reshape(B, S, E)
    o = jnp.einsum("bse,ef->bsf", o, p["wo"], precision=hp) + p["bo"]

    ln1 = _layer_norm(o + xb, p["g1"], p["be1"], eps)
    f = jnp.einsum("bse,ef->bsf", ln1, p["wfc"], precision=hp) + p["bfc"]
    ln2 = _layer_norm(f + ln1, p["g2"], p["be2"], eps)
    return jnp.transpose(ln2, (1, 0, 2))


if __name__ == "__main__":
    SEQ, BATCH, EMBED, HEADS = 8, 2, 32, 4       # small harness; for perf use E % 128 == 0

    key = jax.random.PRNGKey(0)
    kx, kp = jax.random.split(key)
    x = jax.random.normal(kx, (SEQ, BATCH, EMBED), jnp.float32)   # (S, B, E)
    params = init_params(kp, EMBED)

    out = mha_block_forward(x, params, num_heads=HEADS)
    out = jax.block_until_ready(out)

    ref = ref_forward(x, params, num_heads=HEADS)
    assert out.shape == ref.shape == (SEQ, BATCH, EMBED)
    err = float(jnp.max(jnp.abs(out - ref)))
    # Kernel matmuls use bf16 operands (f32 accumulation) and an approx EUP reciprocal;
    # the reference is full-f32 HIGHEST precision — allow a small rounding budget.
    assert err < 3e-2, f"max abs error {err}"
    print("KERNEL_OK")
</pallas_src>

<mosaic_0001>
module attributes {stable_mosaic.version = 11 : i64} {
  func.func @_mha_block_kernel(%arg0: i32, %arg1: memref<1x8x32xf32, #tpu.memory_space<vmem>>, %arg2: memref<32x96xbf16, #tpu.memory_space<vmem>>, %arg3: memref<1x96xf32, #tpu.memory_space<vmem>>, %arg4: memref<32x32xbf16, #tpu.memory_space<vmem>>, %arg5: memref<1x32xf32, #tpu.memory_space<vmem>>, %arg6: memref<1x32xf32, #tpu.memory_space<vmem>>, %arg7: memref<1x32xf32, #tpu.memory_space<vmem>>, %arg8: memref<32x32xbf16, #tpu.memory_space<vmem>>, %arg9: memref<1x32xf32, #tpu.memory_space<vmem>>, %arg10: memref<1x32xf32, #tpu.memory_space<vmem>>, %arg11: memref<1x32xf32, #tpu.memory_space<vmem>>, %arg12: memref<1x8x32xf32, #tpu.memory_space<vmem>>) attributes {dimension_semantics = [#tpu.dimension_semantics<parallel>], iteration_bounds = array<i64: 2>, scalar_prefetch = 0 : i64, scratch_operands = 0 : i64, tpu.core_type = #tpu.core_type<tc>, window_params = [{transform_indices = @transform_0, window_bounds = array<i64: 1, 8, 32>}, {pipeline_mode = #tpu.pipeline_mode<synchronous>, transform_indices = @transform_1, window_bounds = array<i64: 32, 96>}, {pipeline_mode = #tpu.pipeline_mode<synchronous>, transform_indices = @transform_2, window_bounds = array<i64: 1, 96>}, {pipeline_mode = #tpu.pipeline_mode<synchronous>, transform_indices = @transform_3, window_bounds = array<i64: 32, 32>}, {pipeline_mode = #tpu.pipeline_mode<synchronous>, transform_indices = @transform_4, window_bounds = array<i64: 1, 32>}, {pipeline_mode = #tpu.pipeline_mode<synchronous>, transform_indices = @transform_5, window_bounds = array<i64: 1, 32>}, {pipeline_mode = #tpu.pipeline_mode<synchronous>, transform_indices = @transform_6, window_bounds = array<i64: 1, 32>}, {pipeline_mode = #tpu.pipeline_mode<synchronous>, transform_indices = @transform_7, window_bounds = array<i64: 32, 32>}, {pipeline_mode = #tpu.pipeline_mode<synchronous>, transform_indices = @transform_8, window_bounds = array<i64: 1, 32>}, {pipeline_mode = #tpu.pipeline_mode<synchronous>, transform_indices = @transform_9, window_bounds = array<i64: 1, 32>}, {pipeline_mode = #tpu.pipeline_mode<synchronous>, transform_indices = @transform_10, window_bounds = array<i64: 1, 32>}, {transform_indices = @transform_11, window_bounds = array<i64: 1, 8, 32>}]} {
    %c0 = arith.constant 0 : index
    %c0_0 = arith.constant 0 : index
    %c0_1 = arith.constant 0 : index
    %0 = vector.load %arg1[%c0, %c0_0, %c0_1] : memref<1x8x32xf32, #tpu.memory_space<vmem>>, vector<1x8x32xf32>
    %1 = vector.shape_cast %0 : vector<1x8x32xf32> to vector<8x32xf32>
    %2 = arith.truncf %1 : vector<8x32xf32> to vector<8x32xbf16>
    %c0_2 = arith.constant 0 : index
    %c0_3 = arith.constant 0 : index
    %3 = vector.load %arg2[%c0_2, %c0_3] : memref<32x96xbf16, #tpu.memory_space<vmem>>, vector<32x96xbf16>
    %cst = arith.constant dense<0.000000e+00> : vector<8x96xf32>
    %4 = tpu.matmul %2, %3, %cst {dimension_numbers = #tpu.dot_dimension_numbers<[1], [0], [0], [1], [0, 0, 1, 1], [], []>} : vector<8x32xbf16>, vector<32x96xbf16>, vector<8x96xf32> -> vector<8x96xf32>
    %c0_4 = arith.constant 0 : index
    %c0_5 = arith.constant 0 : index
    %5 = vector.load %arg3[%c0_4, %c0_5] : memref<1x96xf32, #tpu.memory_space<vmem>>, vector<1x96xf32>
    %6 = vector.broadcast %5 : vector<1x96xf32> to vector<8x96xf32>
    %7 = arith.addf %4, %6 : vector<8x96xf32>
    %8 = arith.truncf %7 : vector<8x96xf32> to vector<8x96xbf16>
    %9 = vector.shape_cast %8 : vector<8x96xbf16> to vector<1x8x96xbf16>
    %10 = vector.extract_strided_slice %9 {offsets = [0, 0, 0], sizes = [1, 8, 32], strides = [1, 1, 1]} : vector<1x8x96xbf16> to vector<1x8x32xbf16>
    %11 = vector.extract_strided_slice %9 {offsets = [0, 0, 32], sizes = [1, 8, 32], strides = [1, 1, 1]} : vector<1x8x96xbf16> to vector<1x8x32xbf16>
    %12 = vector.extract_strided_slice %9 {offsets = [0, 0, 64], sizes = [1, 8, 32], strides = [1, 1, 1]} : vector<1x8x96xbf16> to vector<1x8x32xbf16>
    %13 = vector.extract_strided_slice %10 {offsets = [0, 0, 0], sizes = [1, 8, 8], strides = [1, 1, 1]} : vector<1x8x32xbf16> to vector<1x8x8xbf16>
    %14 = vector.extract_strided_slice %11 {offsets = [0, 0, 0], sizes = [1, 8, 8], strides = [1, 1, 1]} : vector<1x8x32xbf16> to vector<1x8x8xbf16>
    "tpu.trace_start"() <{level = 10 : i32, message = "bqd,bkd->bqk"}> : () -> ()
    %cst_6 = arith.constant dense<0.000000e+00> : vector<1x8x8xf32>
    %15 = tpu.matmul %13, %14, %cst_6 {dimension_numbers = #tpu.dot_dimension_numbers<[2], [2], [1], [1], [0, 0, 0, 1, 1, 1], [0], [0]>} : vector<1x8x8xbf16>, vector<1x8x8xbf16>, vector<1x8x8xf32> -> vector<1x8x8xf32>
    "tpu.trace_stop"() : () -> ()
    %cst_7 = arith.constant dense<0xFF800000> : vector<1x8xf32>
    %16 = vector.multi_reduction <maximumf>, %15, %cst_7 [2] : vector<1x8x8xf32> to vector<1x8xf32>
    %17 = vector.shape_cast %16 : vector<1x8xf32> to vector<1x8x1xf32>
    %18 = vector.broadcast %17 : vector<1x8x1xf32> to vector<1x8x8xf32>
    %19 = arith.subf %15, %18 : vector<1x8x8xf32>
    %20 = math.exp %19 : vector<1x8x8xf32>
    %cst_8 = arith.constant dense<0.000000e+00> : vector<1x8xf32>
    %21 = vector.multi_reduction <add>, %20, %cst_8 [2] : vector<1x8x8xf32> to vector<1x8xf32>
    %22 = vector.shape_cast %21 : vector<1x8xf32> to vector<1x8x1xf32>
    %23 = tpu.reciprocal %22 {approx = true} : vector<1x8x1xf32> -> vector<1x8x1xf32>
    %24 = vector.broadcast %23 : vector<1x8x1xf32> to vector<1x8x8xf32>
    %25 = arith.mulf %20, %24 : vector<1x8x8xf32>
    %26 = arith.truncf %25 : vector<1x8x8xf32> to vector<1x8x8xbf16>
    %27 = vector.extract_strided_slice %12 {offsets = [0, 0, 0], sizes = [1, 8, 8], strides = [1, 1, 1]} : vector<1x8x32xbf16> to vector<1x8x8xbf16>
    "tpu.trace_start"() <{level = 10 : i32, message = "bqk,bkd->bqd"}> : () -> ()
    %cst_9 = arith.constant dense<0.000000e+00> : vector<1x8x8xf32>
    %28 = tpu.matmul %26, %27, %cst_9 {dimension_numbers = #tpu.dot_dimension_numbers<[2], [1], [1], [2], [0, 0, 0, 1, 1, 2], [0], [0]>} : vector<1x8x8xbf16>, vector<1x8x8xbf16>, vector<1x8x8xf32> -> vector<1x8x8xf32>
    "tpu.trace_stop"() : () -> ()
    %29 = vector.extract_strided_slice %10 {offsets = [0, 0, 8], sizes = [1, 8, 8], strides = [1, 1, 1]} : vector<1x8x32xbf16> to vector<1x8x8xbf16>
    %30 = vector.extract_strided_slice %11 {offsets = [0, 0, 8], sizes = [1, 8, 8], strides = [1, 1, 1]} : vector<1x8x32xbf16> to vector<1x8x8xbf16>
    "tpu.trace_start"() <{level = 10 : i32, message = "bqd,bkd->bqk"}> : () -> ()
    %cst_10 = arith.constant dense<0.000000e+00> : vector<1x8x8xf32>
    %31 = tpu.matmul %29, %30, %cst_10 {dimension_numbers = #tpu.dot_dimension_numbers<[2], [2], [1], [1], [0, 0, 0, 1, 1, 1], [0], [0]>} : vector<1x8x8xbf16>, vector<1x8x8xbf16>, vector<1x8x8xf32> -> vector<1x8x8xf32>
    "tpu.trace_stop"() : () -> ()
    %cst_11 = arith.constant dense<0xFF800000> : vector<1x8xf32>
    %32 = vector.multi_reduction <maximumf>, %31, %cst_11 [2] : vector<1x8x8xf32> to vector<1x8xf32>
    %33 = vector.shape_cast %32 : vector<1x8xf32> to vector<1x8x1xf32>
    %34 = vector.broadcast %33 : vector<1x8x1xf32> to vector<1x8x8xf32>
    %35 = arith.subf %31, %34 : vector<1x8x8xf32>
    %36 = math.exp %35 : vector<1x8x8xf32>
    %cst_12 = arith.constant dense<0.000000e+00> : vector<1x8xf32>
    %37 = vector.multi_reduction <add>, %36, %cst_12 [2] : vector<1x8x8xf32> to vector<1x8xf32>
    %38 = vector.shape_cast %37 : vector<1x8xf32> to vector<1x8x1xf32>
    %39 = tpu.reciprocal %38 {approx = true} : vector<1x8x1xf32> -> vector<1x8x1xf32>
    %40 = vector.broadcast %39 : vector<1x8x1xf32> to vector<1x8x8xf32>
    %41 = arith.mulf %36, %40 : vector<1x8x8xf32>
    %42 = arith.truncf %41 : vector<1x8x8xf32> to vector<1x8x8xbf16>
    %43 = vector.extract_strided_slice %12 {offsets = [0, 0, 8], sizes = [1, 8, 8], strides = [1, 1, 1]} : vector<1x8x32xbf16> to vector<1x8x8xbf16>
    "tpu.trace_start"() <{level = 10 : i32, message = "bqk,bkd->bqd"}> : () -> ()
    %cst_13 = arith.constant dense<0.000000e+00> : vector<1x8x8xf32>
    %44 = tpu.matmul %42, %43, %cst_13 {dimension_numbers = #tpu.dot_dimension_numbers<[2], [1], [1], [2], [0, 0, 0, 1, 1, 2], [0], [0]>} : vector<1x8x8xbf16>, vector<1x8x8xbf16>, vector<1x8x8xf32> -> vector<1x8x8xf32>
    "tpu.trace_stop"() : () -> ()
    %45 = vector.extract_strided_slice %10 {offsets = [0, 0, 16], sizes = [1, 8, 8], strides = [1, 1, 1]} : vector<1x8x32xbf16> to vector<1x8x8xbf16>
    %46 = vector.extract_strided_slice %11 {offsets = [0, 0, 16], sizes = [1, 8, 8], strides = [1, 1, 1]} : vector<1x8x32xbf16> to vector<1x8x8xbf16>
    "tpu.trace_start"() <{level = 10 : i32, message = "bqd,bkd->bqk"}> : () -> ()
    %cst_14 = arith.constant dense<0.000000e+00> : vector<1x8x8xf32>
    %47 = tpu.matmul %45, %46, %cst_14 {dimension_numbers = #tpu.dot_dimension_numbers<[2], [2], [1], [1], [0, 0, 0, 1, 1, 1], [0], [0]>} : vector<1x8x8xbf16>, vector<1x8x8xbf16>, vector<1x8x8xf32> -> vector<1x8x8xf32>
    "tpu.trace_stop"() : () -> ()
    %cst_15 = arith.constant dense<0xFF800000> : vector<1x8xf32>
    %48 = vector.multi_reduction <maximumf>, %47, %cst_15 [2] : vector<1x8x8xf32> to vector<1x8xf32>
    %49 = vector.shape_cast %48 : vector<1x8xf32> to vector<1x8x1xf32>
    %50 = vector.broadcast %49 : vector<1x8x1xf32> to vector<1x8x8xf32>
    %51 = arith.subf %47, %50 : vector<1x8x8xf32>
    %52 = math.exp %51 : vector<1x8x8xf32>
    %cst_16 = arith.constant dense<0.000000e+00> : vector<1x8xf32>
    %53 = vector.multi_reduction <add>, %52, %cst_16 [2] : vector<1x8x8xf32> to vector<1x8xf32>
    %54 = vector.shape_cast %53 : vector<1x8xf32> to vector<1x8x1xf32>
    %55 = tpu.reciprocal %54 {approx = true} : vector<1x8x1xf32> -> vector<1x8x1xf32>
    %56 = vector.broadcast %55 : vector<1x8x1xf32> to vector<1x8x8xf32>
    %57 = arith.mulf %52, %56 : vector<1x8x8xf32>
    %58 = arith.truncf %57 : vector<1x8x8xf32> to vector<1x8x8xbf16>
    %59 = vector.extract_strided_slice %12 {offsets = [0, 0, 16], sizes = [1, 8, 8], strides = [1, 1, 1]} : vector<1x8x32xbf16> to vector<1x8x8xbf16>
    "tpu.trace_start"() <{level = 10 : i32, message = "bqk,bkd->bqd"}> : () -> ()
    %cst_17 = arith.constant dense<0.000000e+00> : vector<1x8x8xf32>
    %60 = tpu.matmul %58, %59, %cst_17 {dimension_numbers = #tpu.dot_dimension_numbers<[2], [1], [1], [2], [0, 0, 0, 1, 1, 2], [0], [0]>} : vector<1x8x8xbf16>, vector<1x8x8xbf16>, vector<1x8x8xf32> -> vector<1x8x8xf32>
    "tpu.trace_stop"() : () -> ()
    %61 = vector.extract_strided_slice %10 {offsets = [0, 0, 24], sizes = [1, 8, 8], strides = [1, 1, 1]} : vector<1x8x32xbf16> to vector<1x8x8xbf16>
    %62 = vector.extract_strided_slice %11 {offsets = [0, 0, 24], sizes = [1, 8, 8], strides = [1, 1, 1]} : vector<1x8x32xbf16> to vector<1x8x8xbf16>
    "tpu.trace_start"() <{level = 10 : i32, message = "bqd,bkd->bqk"}> : () -> ()
    %cst_18 = arith.constant dense<0.000000e+00> : vector<1x8x8xf32>
    %63 = tpu.matmul %61, %62, %cst_18 {dimension_numbers = #tpu.dot_dimension_numbers<[2], [2], [1], [1], [0, 0, 0, 1, 1, 1], [0], [0]>} : vector<1x8x8xbf16>, vector<1x8x8xbf16>, vector<1x8x8xf32> -> vector<1x8x8xf32>
    "tpu.trace_stop"() : () -> ()
    %cst_19 = arith.constant dense<0xFF800000> : vector<1x8xf32>
    %64 = vector.multi_reduction <maximumf>, %63, %cst_19 [2] : vector<1x8x8xf32> to vector<1x8xf32>
    %65 = vector.shape_cast %64 : vector<1x8xf32> to vector<1x8x1xf32>
    %66 = vector.broadcast %65 : vector<1x8x1xf32> to vector<1x8x8xf32>
    %67 = arith.subf %63, %66 : vector<1x8x8xf32>
    %68 = math.exp %67 : vector<1x8x8xf32>
    %cst_20 = arith.constant dense<0.000000e+00> : vector<1x8xf32>
    %69 = vector.multi_reduction <add>, %68, %cst_20 [2] : vector<1x8x8xf32> to vector<1x8xf32>
    %70 = vector.shape_cast %69 : vector<1x8xf32> to vector<1x8x1xf32>
    %71 = tpu.reciprocal %70 {approx = true} : vector<1x8x1xf32> -> vector<1x8x1xf32>
    %72 = vector.broadcast %71 : vector<1x8x1xf32> to vector<1x8x8xf32>
    %73 = arith.mulf %68, %72 : vector<1x8x8xf32>
    %74 = arith.truncf %73 : vector<1x8x8xf32> to vector<1x8x8xbf16>
    %75 = vector.extract_strided_slice %12 {offsets = [0, 0, 24], sizes = [1, 8, 8], strides = [1, 1, 1]} : vector<1x8x32xbf16> to vector<1x8x8xbf16>
    "tpu.trace_start"() <{level = 10 : i32, message = "bqk,bkd->bqd"}> : () -> ()
    %cst_21 = arith.constant dense<0.000000e+00> : vector<1x8x8xf32>
    %76 = tpu.matmul %74, %75, %cst_21 {dimension_numbers = #tpu.dot_dimension_numbers<[2], [1], [1], [2], [0, 0, 0, 1, 1, 2], [0], [0]>} : vector<1x8x8xbf16>, vector<1x8x8xbf16>, vector<1x8x8xf32> -> vector<1x8x8xf32>
    "tpu.trace_stop"() : () -> ()
    %77 = tpu.concatenate %28, %44, %60, %76 in 2 : vector<1x8x8xf32>, vector<1x8x8xf32>, vector<1x8x8xf32>, vector<1x8x8xf32> -> vector<1x8x32xf32>
    %78 = vector.shape_cast %77 : vector<1x8x32xf32> to vector<8x32xf32>
    %79 = arith.truncf %78 : vector<8x32xf32> to vector<8x32xbf16>
    %c0_22 = arith.constant 0 : index
    %c0_23 = arith.constant 0 : index
    %80 = vector.load %arg4[%c0_22, %c0_23] : memref<32x32xbf16, #tpu.memory_space<vmem>>, vector<32x32xbf16>
    %cst_24 = arith.constant dense<0.000000e+00> : vector<8x32xf32>
    %81 = tpu.matmul %79, %80, %cst_24 {dimension_numbers = #tpu.dot_dimension_numbers<[1], [0], [0], [1], [0, 0, 1, 1], [], []>} : vector<8x32xbf16>, vector<32x32xbf16>, vector<8x32xf32> -> vector<8x32xf32>
    %c0_25 = arith.constant 0 : index
    %c0_26 = arith.constant 0 : index
    %82 = vector.load %arg5[%c0_25, %c0_26] : memref<1x32xf32, #tpu.memory_space<vmem>>, vector<1x32xf32>
    %83 = vector.broadcast %82 : vector<1x32xf32> to vector<8x32xf32>
    %84 = arith.addf %81, %83 : vector<8x32xf32>
    %85 = arith.addf %84, %1 : vector<8x32xf32>
    %c0_27 = arith.constant 0 : index
    %c0_28 = arith.constant 0 : index
    %86 = vector.load %arg6[%c0_27, %c0_28] : memref<1x32xf32, #tpu.memory_space<vmem>>, vector<1x32xf32>
    %c0_29 = arith.constant 0 : index
    %c0_30 = arith.constant 0 : index
    %87 = vector.load %arg7[%c0_29, %c0_30] : memref<1x32xf32, #tpu.memory_space<vmem>>, vector<1x32xf32>
    %cst_31 = arith.constant dense<0.000000e+00> : vector<8xf32>
    %88 = vector.multi_reduction <add>, %85, %cst_31 [1] : vector<8x32xf32> to vector<8xf32>
    %89 = vector.shape_cast %88 : vector<8xf32> to vector<8x1xf32>
    %cst_32 = arith.constant 3.200000e+01 : f32
    %90 = vector.broadcast %cst_32 : f32 to vector<8x1xf32>
    %91 = arith.divf %89, %90 : vector<8x1xf32>
    %92 = vector.broadcast %91 : vector<8x1xf32> to vector<8x32xf32>
    %93 = arith.subf %85, %92 : vector<8x32xf32>
    %94 = arith.mulf %93, %93 : vector<8x32xf32>
    %cst_33 = arith.constant dense<0.000000e+00> : vector<8xf32>
    %95 = vector.multi_reduction <add>, %94, %cst_33 [1] : vector<8x32xf32> to vector<8xf32>
    %96 = vector.shape_cast %95 : vector<8xf32> to vector<8x1xf32>
    %cst_34 = arith.constant 3.200000e+01 : f32
    %97 = vector.broadcast %cst_34 : f32 to vector<8x1xf32>
    %98 = arith.divf %96, %97 : vector<8x1xf32>
    %cst_35 = arith.constant 9.99999974E-6 : f32
    %99 = vector.broadcast %cst_35 : f32 to vector<8x1xf32>
    %100 = arith.addf %98, %99 : vector<8x1xf32>
    %101 = math.rsqrt %100 : vector<8x1xf32>
    %102 = vector.broadcast %101 : vector<8x1xf32> to vector<8x32xf32>
    %103 = arith.mulf %93, %102 : vector<8x32xf32>
    %104 = vector.broadcast %86 : vector<1x32xf32> to vector<8x32xf32>
    %105 = arith.mulf %103, %104 : vector<8x32xf32>
    %106 = vector.broadcast %87 : vector<1x32xf32> to vector<8x32xf32>
    %107 = arith.addf %105, %106 : vector<8x32xf32>
    %108 = arith.truncf %107 : vector<8x32xf32> to vector<8x32xbf16>
    %c0_36 = arith.constant 0 : index
    %c0_37 = arith.constant 0 : index
    %109 = vector.load %arg8[%c0_36, %c0_37] : memref<32x32xbf16, #tpu.memory_space<vmem>>, vector<32x32xbf16>
    %cst_38 = arith.constant dense<0.000000e+00> : vector<8x32xf32>
    %110 = tpu.matmul %108, %109, %cst_38 {dimension_numbers = #tpu.dot_dimension_numbers<[1], [0], [0], [1], [0, 0, 1, 1], [], []>} : vector<8x32xbf16>, vector<32x32xbf16>, vector<8x32xf32> -> vector<8x32xf32>
    %c0_39 = arith.constant 0 : index
    %c0_40 = arith.constant 0 : index
    %111 = vector.load %arg9[%c0_39, %c0_40] : memref<1x32xf32, #tpu.memory_space<vmem>>, vector<1x32xf32>
    %112 = vector.broadcast %111 : vector<1x32xf32> to vector<8x32xf32>
    %113 = arith.addf %110, %112 : vector<8x32xf32>
    %114 = arith.addf %113, %107 : vector<8x32xf32>
    %c0_41 = arith.constant 0 : index
    %c0_42 = arith.constant 0 : index
    %115 = vector.load %arg10[%c0_41, %c0_42] : memref<1x32xf32, #tpu.memory_space<vmem>>, vector<1x32xf32>
    %c0_43 = arith.constant 0 : index
    %c0_44 = arith.constant 0 : index
    %116 = vector.load %arg11[%c0_43, %c0_44] : memref<1x32xf32, #tpu.memory_space<vmem>>, vector<1x32xf32>
    %cst_45 = arith.constant dense<0.000000e+00> : vector<8xf32>
    %117 = vector.multi_reduction <add>, %114, %cst_45 [1] : vector<8x32xf32> to vector<8xf32>
    %118 = vector.shape_cast %117 : vector<8xf32> to vector<8x1xf32>
    %cst_46 = arith.constant 3.200000e+01 : f32
    %119 = vector.broadcast %cst_46 : f32 to vector<8x1xf32>
    %120 = arith.divf %118, %119 : vector<8x1xf32>
    %121 = vector.broadcast %120 : vector<8x1xf32> to vector<8x32xf32>
    %122 = arith.subf %114, %121 : vector<8x32xf32>
    %123 = arith.mulf %122, %122 : vector<8x32xf32>
    %cst_47 = arith.constant dense<0.000000e+00> : vector<8xf32>
    %124 = vector.multi_reduction <add>, %123, %cst_47 [1] : vector<8x32xf32> to vector<8xf32>
    %125 = vector.shape_cast %124 : vector<8xf32> to vector<8x1xf32>
    %cst_48 = arith.constant 3.200000e+01 : f32
    %126 = vector.broadcast %cst_48 : f32 to vector<8x1xf32>
    %127 = arith.divf %125, %126 : vector<8x1xf32>
    %cst_49 = arith.constant 9.99999974E-6 : f32
    %128 = vector.broadcast %cst_49 : f32 to vector<8x1xf32>
    %129 = arith.addf %127, %128 : vector<8x1xf32>
    %130 = math.rsqrt %129 : vector<8x1xf32>
    %131 = vector.broadcast %130 : vector<8x1xf32> to vector<8x32xf32>
    %132 = arith.mulf %122, %131 : vector<8x32xf32>
    %133 = vector.broadcast %115 : vector<1x32xf32> to vector<8x32xf32>
    %134 = arith.mulf %132, %133 : vector<8x32xf32>
    %135 = vector.broadcast %116 : vector<1x32xf32> to vector<8x32xf32>
    %136 = arith.addf %134, %135 : vector<8x32xf32>
    %137 = vector.shape_cast %136 : vector<8x32xf32> to vector<1x8x32xf32>
    %c0_50 = arith.constant 0 : index
    %c0_51 = arith.constant 0 : index
    %c0_52 = arith.constant 0 : index
    %138 = vector.load %arg12[%c0_50, %c0_51, %c0_52] : memref<1x8x32xf32, #tpu.memory_space<vmem>>, vector<1x8x32xf32>
    tpu.vector_store %arg12[%c0_50, %c0_51, %c0_52], %137 {strides = array<i32>} : memref<1x8x32xf32, #tpu.memory_space<vmem>>, vector<1x8x32xf32>,
    return
  }
  func.func @transform_0(%arg0: i32) -> (i32, i32, i32) {
    %c0_i32 = arith.constant 0 : i32
    %c0_i32_0 = arith.constant 0 : i32
    %c0_i32_1 = arith.constant 0 : i32
    return %arg0, %c0_i32, %c0_i32_0 : i32, i32, i32
  }
  func.func @transform_1(%arg0: i32) -> (i32, i32) {
    %c0_i32 = arith.constant 0 : i32
    %c0_i32_0 = arith.constant 0 : i32
    %c0_i32_1 = arith.constant 0 : i32
    return %c0_i32, %c0_i32_0 : i32, i32
  }
  func.func @transform_2(%arg0: i32) -> (i32, i32) {
    %c0_i32 = arith.constant 0 : i32
    %c0_i32_0 = arith.constant 0 : i32
    %c0_i32_1 = arith.constant 0 : i32
    return %c0_i32, %c0_i32_0 : i32, i32
  }
  func.func @transform_3(%arg0: i32) -> (i32, i32) {
    %c0_i32 = arith.constant 0 : i32
    %c0_i32_0 = arith.constant 0 : i32
    %c0_i32_1 = arith.constant 0 : i32
    return %c0_i32, %c0_i32_0 : i32, i32
  }
  func.func @transform_4(%arg0: i32) -> (i32, i32) {
    %c0_i32 = arith.constant 0 : i32
    %c0_i32_0 = arith.constant 0 : i32
    %c0_i32_1 = arith.constant 0 : i32
    return %c0_i32, %c0_i32_0 : i32, i32
  }
  func.func @transform_5(%arg0: i32) -> (i32, i32) {
    %c0_i32 = arith.constant 0 : i32
    %c0_i32_0 = arith.constant 0 : i32
    %c0_i32_1 = arith.constant 0 : i32
    return %c0_i32, %c0_i32_0 : i32, i32
  }
  func.func @transform_6(%arg0: i32) -> (i32, i32) {
    %c0_i32 = arith.constant 0 : i32
    %c0_i32_0 = arith.constant 0 : i32
    %c0_i32_1 = arith.constant 0 : i32
    return %c0_i32, %c0_i32_0 : i32, i32
  }
  func.func @transform_7(%arg0: i32) -> (i32, i32) {
    %c0_i32 = arith.constant 0 : i32
    %c0_i32_0 = arith.constant 0 : i32
    %c0_i32_1 = arith.constant 0 : i32
    return %c0_i32, %c0_i32_0 : i32, i32
  }
  func.func @transform_8(%arg0: i32) -> (i32, i32) {
    %c0_i32 = arith.constant 0 : i32
    %c0_i32_0 = arith.constant 0 : i32
    %c0_i32_1 = arith.constant 0 : i32
    return %c0_i32, %c0_i32_0 : i32, i32
  }
  func.func @transform_9(%arg0: i32) -> (i32, i32) {
    %c0_i32 = arith.constant 0 : i32
    %c0_i32_0 = arith.constant 0 : i32
    %c0_i32_1 = arith.constant 0 : i32
    return %c0_i32, %c0_i32_0 : i32, i32
  }
  func.func @transform_10(%arg0: i32) -> (i32, i32) {
    %c0_i32 = arith.constant 0 : i32
    %c0_i32_0 = arith.constant 0 : i32
    %c0_i32_1 = arith.constant 0 : i32
    return %c0_i32, %c0_i32_0 : i32, i32
  }
  func.func @transform_11(%arg0: i32) -> (i32, i32, i32) {
    %c0_i32 = arith.constant 0 : i32
    %c0_i32_0 = arith.constant 0 : i32
    %c0_i32_1 = arith.constant 0 : i32
    return %arg0, %c0_i32, %c0_i32_0 : i32, i32, i32
  }
}

</mosaic_0001>

<bundles_post_ra>
// kernel: tpu_custom_call.1
= control target key start
LH: loop header
LB: loop body
LE: loop exit
PB: predicated region body
PF: predicated region fallthrough
CT: control target
= control target key end

     0   :  { %s2095_s0 = inlined_call_operand.hbm [shape: f32[2,8,32], index: 0, kind: input, shape index: {}]   ;;  %s2096_s1 = inlined_call_operand.hbm [shape: bf16[32,96], index: 1, kind: input, shape index: {}]   ;;  %s2097_s2 = inlined_call_operand.vmem [shape: f32[1,96], index: 2, kind: input, shape index: {}]   ;;  %s2098_s3 = inlined_call_operand.hbm [shape: bf16[32,32], index: 3, kind: input, shape index: {}]   ;;  %s2099_s4 = inlined_call_operand.vmem [shape: f32[1,32], index: 4, kind: input, shape index: {}]   ;;  %s2100_s5 = inlined_call_operand.vmem [shape: f32[1,32], index: 5, kind: input, shape index: {}]   ;;  %s2101_s6 = inlined_call_operand.vmem [shape: f32[1,32], index: 6, kind: input, shape index: {}]   ;;  %s2102_s7 = inlined_call_operand.vmem [shape: bf16[32,32], index: 7, kind: input, shape index: {}]   ;;  %s2103_s8 = inlined_call_operand.vmem [shape: f32[1,32], index: 8, kind: input, shape index: {}]   ;;  %s2104_s9 = inlined_call_operand.vmem [shape: f32[1,32], index: 9, kind: input, shape index: {}]   ;;  %s2105_s10 = inlined_call_operand.vmem [shape: f32[1,32], index: 10, kind: input, shape index: {}]   ;;  %s2106_s11 = inlined_call_operand.hbm [shape: f32[2,8,32], index: 11, kind: output, shape index: {}]  }
   0x1   :  { %2113 = sst [smem:[#allocation14_spill]] %s2095_s0 }
   0x2   :  { %2114 = sst [smem:[#allocation15_spill]] %s2106_s11 }
   0x3   :  { %16 = vsyncpa [#allocation3], 0 }
   0x4   :  { %18 = vsyncpa [#allocation3 + $0x1], 0 }
   0x5   :  { %19 = vsyncpa [#allocation6], 0 }
   0x6   :  { %20 = vsyncpa [#allocation4], 0 }
   0x7   :  { %22 = vsyncpa [#allocation4 + $0x1], 0  ;;  %s1747_s17 = smov 0   ;;  %s1749_s18 = smov 0  }
   0x8   :  { %s1751_s19 = smov 0   ;;  %s1753_s20 = smov 0  }
   0x9 LB: > { %2115 = sst [smem:[#allocation12_spill]] %s1651_s17  ;;  %s1768_s21 = sadd.s32 4294967295, %s1663_s20   ;;  %s1663_s20 = sphi %s1753_s20, %s2138_s20   ;;  %s1659_s19 = sphi %s1751_s19, %s2137_s19   ;;  %s1655_s18 = sphi %s1749_s18, %s2136_s18   ;;  %s1651_s17 = sphi %s1747_s17, %s2135_s17  }
   0xa   : > { %s1259_s22 = sadd.s32 4294967294, %s1663_s20   ;;  %p48_p0 = scmp.ne.s32.totalorder %s1655_s18, %s1651_s17 }
   0xb   : > { %p2107_p1 = scmp.eq.s32.totalorder %s1768_s21, 0  ;;  %p288_p3 = scmp.eq.s32.totalorder %s1259_s22, 1 }
   0xc   : > { %p1260_p5 = scmp.ge.s32.totalorder %s1663_s20, 1  ;;  %p295_p7 = scmp.lt.s32.totalorder %s1663_s20, 3 }
   0xd   : > { %p1777_p4 = por %p2107_p1, %p48_p0  ;;  %p1782_p6 = por %p288_p3, %p48_p0 }
   0xe   : > { %p1787_p8 = pnand %p1260_p5, %p295_p7  ;;  %s1665_s26 = smov [#allocation5]  }
   0xf   : > { %s2116_s23 = scalar_select %p1777_p4, 1, 0 }
  0x10   : > { %s2117_s24 = scalar_select %p1782_p6, 1, 0 }
  0x11   : > { %s307_s27 = sshll.u32 %s1665_s26, 4  ;;  %p1408_p9 = pneg %p1787_p8  ;;  %s1791_s27 = int_to_ptr.vmem [resolvable:$true] %s307_s27 }
  0x12   : > { %2118 = sst [smem:[#allocation13_spill]] %s2117_s24  ;;  %s1666_s29 = smov [#allocation7]  }
  0x13   : > { %p1798_p11 = pnand %p1408_p9, %p2107_p1  ;;  %s323_s30 = sshll.u32 %s1666_s29, 4  ;;  %s1802_s30 = int_to_ptr.vmem [resolvable:$true] %s323_s30 }
  0x14   : > { %s1507_s14 = scalar_lea.hbm %s2096_s1, 256 }
  0x15   : > { %p1508_p12 = scmp.ne.s32.totalorder %s2096_s1, %s1507_s14  ;;  %p1509_p13 = pneg %p1798_p11 }
  0x16   : > { %p1514_p5 = scmp.lt.u32.totalorder %s1507_s14, %s2096_s1 }
  0x17   : > { %p1510_p0 = pnand %p1509_p13, %p1508_p12 }
  0x19   : > { %p1511_p3 = pneg %p1510_p0 }
  0x1b   : > { %p1516_p7 = pnand %p1514_p5, %p1511_p3 }
  0x1d   : > { %1519 = shalt.err (!%p1516_p7)
}
  0x1e   : > { %s1520_s29 = scalar_lea.vmem %s1791_s27, 256  ;;  %p1528_p2 = scmp.lt.s32.totalorder %s1791_s27, %s1791_s27 }
  0x1f   : > { %p1521_p9 = scmp.ne.s32.totalorder %s1791_s27, %s1520_s29  ;;  %p1529_p12 = scmp.lt.s32.totalorder %s1520_s29, %s1520_s29 }
  0x21   : > { %p1523_p10 = pnand %p1521_p9, %p1509_p13  ;;  %p1530_p0 = por %p1529_p12, %p1528_p2 }
  0x23   : > { %p1524_p1 = pneg %p1523_p10 }
  0x25   : > { %p1531_p6 = pnand %p1530_p0, %p1524_p1 }
  0x27   : > { %1534 = shalt.err (!%p1531_p6)
}
  0x28   : > { %s1667_s12 = smov 64   ;;  %s1668_s13 = smov 4  }
  0x29   : > { %1411 = dma.hbm_to_vmem [thread:$0]  (!%p1798_p11), %s2096_s1, 256, %s1791_s27, [#allocation6], %s1667_s12, %s1667_s12, %s1668_s13  }
  0x2a   : > { %s1535_s26 = scalar_lea.hbm %s2098_s3, 256 }
  0x2b   : > { %p1536_p2 = scmp.ne.s32.totalorder %s2098_s3, %s1535_s26  ;;  %p1542_p10 = scmp.lt.u32.totalorder %s1535_s26, %s2098_s3 }
  0x2d   : > { %p1538_p1 = pnand %p1536_p2, %p1509_p13 }
  0x2f   : > { %p1539_p6 = pneg %p1538_p1 }
  0x31   : > { %p1544_p3 = pnand %p1542_p10, %p1539_p6 }
  0x33   : > { %1547 = shalt.err (!%p1544_p3)
}
  0x34   : > { %s1548_s27 = scalar_lea.vmem %s1802_s30, 256  ;;  %p1556_p12 = scmp.lt.s32.totalorder %s1802_s30, %s1802_s30 }
  0x35   : > { %p1549_p5 = scmp.ne.s32.totalorder %s1802_s30, %s1548_s27  ;;  %p1557_p0 = scmp.lt.s32.totalorder %s1548_s27, %s1548_s27 }
  0x37   : > { %p1551_p7 = pnand %p1549_p5, %p1509_p13  ;;  %p1558_p2 = por %p1557_p0, %p1556_p12 }
  0x39   : > { %p1552_p9 = pneg %p1551_p7 }
  0x3b   : > { %p1559_p1 = pnand %p1558_p2, %p1552_p9 }
  0x3d   : > { %1562 = shalt.err (!%p1559_p1)
}
  0x3e   : > { %1414 = dma.hbm_to_vmem [thread:$0]  (!%p1798_p11), %s2098_s3, 256, %s1802_s30, [#allocation6], %s1667_s12, %s1667_s12, %s1668_s13  }
  0x3f   : > { %s1857_s24 = sadd.s32 1, %s1663_s20   ;;  %s35_s28 = sadd.s32 1, %s1659_s19 }
  0x40   : > { %s32_s14 = ssub.s32 %s1663_s20, %s1857_s24  ;;  %p42_p13 = scmp.ne.s32.totalorder %s1659_s19, %s1655_s18 }
  0x41   : > { %p33_p6 = scmp.eq.s32.totalorder %s32_s14, 0  ;;  %p43_p10 = scmp.eq.s32.totalorder %s1663_s20, 0 }
  0x42   : > { %p2121_p3 = scmp.eq.s32.totalorder %s1768_s21, 1  ;;  %p1425_p7 = scmp.lt.s32.totalorder %s1663_s20, 2 }
  0x43   : > { %s1873_s16 = scalar_select %p33_p6, %s1659_s19, %s35_s28  }
  0x44   : > { %p1867_p5 = por %p2121_p3, %p42_p13  ;;  %p44_p9 = por %p43_p10, %p42_p13 }
  0x45   : > { %s358_s22 = sand.u32 1, %s1659_s19   ;;  %s1265_s30 = sshll.u32 %s1663_s20, 7 }
  0x46   : > { %s2122_s15 = scalar_select %p1867_p5, 1, 0 }
  0x47   : > { %s1264_s26 = sshll.u32 %s358_s22, 3  ;;  %s2123_s0 = sld [smem:[#allocation14_spill]] }
  0x48   : > { %s362_s27 = scalar_lea.vmem [#allocation2], %s1264_s26  ;;  %p1884_p11 = pnand %p1425_p7, %p44_p9 }
  0x49   : > { %s369_s11 = sshll.u32 %s362_s27, 4  ;;  %s359_s28 = scalar_lea.sflag [#allocation3], %s358_s22  ;;  %s1882_s11 = int_to_ptr.vmem [resolvable:$true] %s369_s11 }
  0x4a   : > { %p1565_p0 = pneg %p1884_p11 }
  0x4d   : > { %s1880_s29 = scalar_lea.hbm %s2123_s0, %s1265_s30  ;;  %s1568_s12 = scalar_lea.hbm %s2123_s0, 256 }
  0x4e   : > { %s1563_s14 = scalar_lea.hbm %s1880_s29, 128  ;;  %p1569_p13 = scmp.lt.u32.totalorder %s1880_s29, %s2123_s0 }
  0x4f   : > { %p1564_p12 = scmp.ne.s32.totalorder %s1880_s29, %s1563_s14  ;;  %p1570_p6 = scmp.lt.u32.totalorder %s1568_s12, %s1563_s14 }
  0x50   : > { %p1572_p3 = scmp.lt.u32.totalorder %s1563_s14, %s1880_s29 }
  0x51   : > { %p1566_p2 = pnand %p1565_p0, %p1564_p12  ;;  %p1571_p10 = por %p1570_p6, %p1569_p13 }
  0x53   : > { %p1567_p1 = pneg %p1566_p2  ;;  %p1573_p7 = por %p1572_p3, %p1571_p10 }
  0x55   : > { %p1574_p9 = pnand %p1573_p7, %p1567_p1 }
  0x57   : > { %1577 = shalt.err (!%p1574_p9)
}
  0x58   : > { %s1578_s22 = scalar_lea.vmem %s1882_s11, 128  ;;  %s1669_s30 = smov [#allocation2]  }
  0x59   : > { %p1579_p12 = scmp.ne.s32.totalorder %s1882_s11, %s1578_s22  ;;  %s1583_s26 = sshll.u32 %s1669_s30, 4  ;;  %s1584_s26 = int_to_ptr.vmem [resolvable:$false] %s1583_s26 }
  0x5a   : > { %s1585_s13 = scalar_lea.vmem %s1584_s26, 256  ;;  %p1586_p4 = scmp.lt.s32.totalorder %s1882_s11, %s1584_s26 }
  0x5b   : > { %p1581_p2 = pnand %p1579_p12, %p1565_p0  ;;  %p1587_p13 = scmp.lt.s32.totalorder %s1585_s13, %s1578_s22 }
  0x5d   : > { %p1582_p5 = pneg %p1581_p2  ;;  %p1588_p6 = por %p1587_p13, %p1586_p4 }
  0x5f   : > { %p1589_p10 = pnand %p1588_p6, %p1582_p5 }
  0x61   : > { %1592 = shalt.err (!%p1589_p10)
}
  0x62   : > { %1418 = dma.hbm_to_vmem [thread:$0]  (!%p1884_p11), %s1880_s29, 128, %s1882_s11, %s359_s28  }
  0x63   : > { %378 = sbr.rel (%p1787_p8) target bundleno = 2453 (0x995), region = 64  ;;  %s1916_s14 = sand.u32 (!%p1787_p8), 1, %s1655_s18  }
  0x64   : > { %s1267_s12 = sshll.u32 (!%p1787_p8), %s1916_s14, 3  ;;  %s381_s27 = scalar_lea.sflag (!%p1787_p8), [#allocation3], %s1916_s14 }
  0x65   : > { %s384_s22 = scalar_lea.vmem (!%p1787_p8), [#allocation2], %s1267_s12  ;;  %p2125_p4 = scmp.ne.s32.totalorder (!%p1787_p8), %s2116_s23, 0 }
  0x6a   : > { %1638 = dma.done.wait (%p2125_p4), %s381_s27, 128  }
  0x6b   : > { %1640 = vsyncadd (%p2125_p4), %s381_s27, 4294967168  ;;  %p2126_p5 = scmp.eq.s32.totalorder %s1768_s21, 0 }
  0x6d   : > { %1642 = dma.done.wait (%p2126_p5), [#allocation6], 512   ;;  %p2127_p8 = pmov %p2126_p5 }
  0x6e   : > { %v1670_v0 = vmov 0.0   ;;  %vm1671_vm0 = vmmov 0   ;;  %v1481_v1 = vld [vmem:[#allocation5] sm:$0xff]   ;;  %v1482_v2 = vld [vmem:[#allocation5 + $0x8] sm:$0xff]   ;;  %v1936_v3 = vld [vmem:[%s384_s22] sm:$0xff]  ;;  %vm457_vm1 = vcmask 261120  }
  0x6f   : > { %1644 = vsyncadd (%p2127_p8), [#allocation6], 4294966784  ;;  %1324 = vmatprep.subr.bf16.mxu0 %v1670_v0  ;;  %1328 = vmatprep.mubr.msk.bf16.mxu0 %vm1671_vm0, %v1670_v0  ;;  %v433_v4 = vpack.c.bf16 %v1936_v3, %v1936_v3  ;;  %v1271_v5 = vld [vmem:[%s2097_s2] ss:$0 sm:$0xff]  ;;  %s1672_s29 = smov 120   ;;  %s1673_s11 = smov 96  }
  0x70   : > { %1332 = vmatprep.subr.bf16.mxu1 %v1670_v0  ;;  %1334 = vmatprep.mubr.msk.bf16.mxu1 %vm1671_vm0, %v1670_v0  ;;  %s1674_s17 = smov 80   ;;  %s1675_s28 = smov 88   ;;  %vm505_vm2 = vcmask 64512   ;;  %vm569_vm3 = vcmask 1043456   ;;  %vm956_vm4 = vcmask 130048   ;;  %vm958_vm5 = vcmask 195584  }
  0x71   : > { %1325 = vmatpush3.bf16.msra.mxu0 %v1481_v1  ;;  %s1676_s30 = smov 72   ;;  %s1677_s26 = smov 112  }
  0x72   : > { %1326 = vmatprep.subr.bf16.mxu0 %v1670_v0  ;;  %s1678_s13 = smov 104   ;;  %s1679_s27 = smov 56  }
  0x73   : > { %s1680_s22 = smov 64   ;;  %s1681_s23 = smov 40  }
  0x74   : > { %s1682_s25 = smov 48   ;;  %p2130_p0 = scmp.ne.s32.totalorder %s2122_s15, 0 }
  0x75   : > { %1327 = vmatpush3.bf16.msra.mxu0 %v1482_v2 }
  0x76   : > { %1338 = vmatprep.subr.bf16.mxu0 %v1670_v0 }
  0x78   : > { %1329 = vmatmul.mubr.msk.bf16.vlgmr.msra.gmra.mrb[0].mxu0 %vm457_vm1, %v433_v4 }
  0x79   : > { %1340 = vmatprep.mubr.msk.bf16.mxu0 %vm1671_vm0, %v1670_v0 }
 0x14b   : > { %v495_v6 = vpop.f32.mrb[0].mxu0 }
 0x14c   : > { %v496_v7 = vadd.f32 %v1271_v5, %v495_v6  ;;  %v1330_v8 = vpop.f32.mrb[1].mxu0 }
 0x14d   : > { %v498_v9 = vpop.f32.mrb[2].mxu0 }
 0x14e   : > { %v1948_v10 = vpack.c.bf16 %v496_v7, %v496_v7  ;;  %v1331_v11 = vpop.f32.mrb[3].mxu0 }
 0x150   : > { %613 = vrot.lane.b32.xlu1 %v1948_v10, %s1672_s29  ;;  %503 = vrot.lane.b32.xlu0 %v1948_v10, %s1673_s11  ;;  %s1683_s29 = smov 8   ;;  %s1684_s11 = smov 16  }
 0x154   : > { %725 = vrot.lane.b32.xlu1 %v1948_v10, %s1674_s17  ;;  %615 = vrot.lane.b32.xlu0 %v1948_v10, %s1675_s28  ;;  %s1685_s17 = smov 24  }
 0x158   : > { %835 = vrot.lane.b32.xlu1 %v1948_v10, %s1676_s30  ;;  %723 = vrot.lane.b32.xlu0 %v1948_v10, %s1677_s26  ;;  %s1157_s30 = scalar_lea.sflag [#allocation4], %s1916_s14 }
 0x15c   : > { %833 = vrot.lane.b32.xlu0 %v1948_v10, %s1678_s13 }
 0x1c2   : > { %v504_v12 = vpop.permute.xlu0 %503  ;;  %v614_v15 = vpop.permute.xlu1 %613 }
 0x1c3   : > { %v510_v13 = vsel %vm505_vm2, %v504_v12, 0 }
 0x1c4   : > { %1333 = vmatpush3.bf16.xpose.msra.mxu1 %v510_v13 }
 0x1c5   : > { %1344 = vmatprep.subr.bf16.mxu1 %v1670_v0 }
 0x1c6   : > { %v616_v14 = vpop.permute.xlu0 %615  ;;  %v726_v17 = vpop.permute.xlu1 %725 }
 0x1c7   : > { %v621_v16 = vsel %vm505_vm2, %v616_v14, 0  ;;  %v731_v18 = vsel %vm505_vm2, %v726_v17, 0 }
 0x1ca   : > { %v836_v19 = vpop.permute.xlu1 %835  ;;  %v724_v20 = vpop.permute.xlu0 %723 }
 0x1cb   : > { %1335 = vmatmul.mubr.msk.bf16.vlgmr.msra.gmra.mrb[0].mxu1 %vm505_vm2, %v1948_v10  ;;  %v841_v21 = vsel %vm505_vm2, %v836_v19, 0 }
 0x1cc   : > { %1345 = vmatpush3.bf16.xpose.msra.mxu1 %v621_v16  ;;  %1346 = vmatprep.mubr.msk.bf16.mxu1 %vm1671_vm0, %v1670_v0 }
 0x1cd   : > { %1356 = vmatprep.subr.bf16.mxu1 %v1670_v0 }
 0x1ce   : > { %v834_v22 = vpop.permute.xlu0 %833 }
 0x1d3   : > { %1347 = vmatmul.mubr.msk.bf16.vlgmr.msra.gmra.mrb[4].mxu1 %vm505_vm2, %v614_v15 }
 0x1d4   : > { %1357 = vmatpush3.bf16.xpose.msra.mxu1 %v731_v18  ;;  %1358 = vmatprep.mubr.msk.bf16.mxu1 %vm1671_vm0, %v1670_v0 }
 0x1d5   : > { %1368 = vmatprep.subr.bf16.mxu1 %v1670_v0 }
 0x1db   : > { %1359 = vmatmul.mubr.msk.bf16.vlgmr.msra.gmra.mrb[8].mxu1 %vm505_vm2, %v724_v20 }
 0x1dc   : > { %1369 = vmatpush3.bf16.xpose.msra.mxu1 %v841_v21  ;;  %1370 = vmatprep.mubr.msk.bf16.mxu1 %vm1671_vm0, %v1670_v0 }
 0x1dd   : > { %1380 = vmatprep.subr.bf16.mxu1 %v1670_v0 }
 0x1e3   : > { %1371 = vmatmul.mubr.msk.bf16.vlgmr.msra.gmra.mrb[12].mxu1 %vm505_vm2, %v834_v22 }
 0x1e4   : > { %1384 = vmatprep.mubr.msk.bf16.mxu1 %vm1671_vm0, %v1670_v0 }
 0x29e   : > { %v546_v23 = vpop.f32.mrb[0].mxu1 }
 0x29f   : > { %v1336_v24 = vpop.f32.mrb[1].mxu1  ;;  %v552_v25 = vsel %vm505_vm2, %v546_v23, -inf }
 0x2a0   : > { %553 = vmax.xlane.f32.xlu1 %v552_v25  ;;  %v549_v26 = vpop.f32.mrb[2].mxu1 }
 0x2a1   : > { %v1337_v27 = vpop.f32.mrb[3].mxu1 }
 0x2a6   : > { %v657_v28 = vpop.f32.mrb[4].mxu1 }
 0x2a7   : > { %v1348_v29 = vpop.f32.mrb[5].mxu1  ;;  %v663_v30 = vsel %vm505_vm2, %v657_v28, -inf }
 0x2a8   : > { %664 = vmax.xlane.f32.xlu0 %v663_v30  ;;  %v660_v31 = vpop.f32.mrb[6].mxu1 }
 0x2a9   : > { %v1349_v32 = vpop.f32.mrb[7].mxu1 }
 0x2ae   : > { %v767_v33 = vpop.f32.mrb[8].mxu1 }
 0x2af   : > { %v1360_v34 = vpop.f32.mrb[9].mxu1  ;;  %v773_v35 = vsel %vm505_vm2, %v767_v33, -inf }
 0x2b0   : > { %774 = vmax.xlane.f32.xlu0 %v773_v35  ;;  %v770_v36 = vpop.f32.mrb[10].mxu1  ;;  %v1484_v34 = vld [vmem:[#allocation7 + $0x8] sm:$0xff]  }
 0x2b1   : > { %v1361_v37 = vpop.f32.mrb[11].mxu1 }
 0x2b6   : > { %v877_v38 = vpop.f32.mrb[12].mxu1 }
 0x2b7   : > { %v1372_v39 = vpop.f32.mrb[13].mxu1  ;;  %v883_v40 = vsel %vm505_vm2, %v877_v38, -inf }
 0x2b8   : > { %884 = vmax.xlane.f32.xlu1 %v883_v40  ;;  %v880_v41 = vpop.f32.mrb[14].mxu1 }
 0x2b9   : > { %v1373_v42 = vpop.f32.mrb[15].mxu1 }
 0x32d   : > { %v554_v43 = vpop.xlane.xlu1 %553 }
 0x32e   : > { %v555_v44 = vsub.f32 %v546_v23, %v554_v43 }
 0x330   : > { %v556_v45 = vmul.f32 1.442695, %v555_v44 }
 0x332   : > { %1487 = vpow2.f32 %v556_v45 }
 0x335   : > { %v665_v46 = vpop.xlane.xlu0 %664 }
 0x336   : > { %v666_v47 = vsub.f32 %v657_v28, %v665_v46 }
 0x338   : > { %v667_v48 = vmul.f32 1.442695, %v666_v47 }
 0x33a   : > { %1489 = vpow2.f32 %v667_v48 }
 0x33c   : > { %v1488_v49 = vpop.eup %1487 }
 0x33d   : > { %v775_v50 = vpop.xlane.xlu0 %774  ;;  %v558_v51 = vsel %vm505_vm2, %v1488_v49, 0.0 }
 0x33e   : > { %v776_v52 = vsub.f32 %v767_v33, %v775_v50  ;;  %559 = vadd.xlane.f32.xlu0 %v558_v51  ;;  %v1483_v33 = vld [vmem:[#allocation7] sm:$0xff]  }
 0x33f   : > { %1381 = vmatpush3.bf16.msra.mxu1 %v1483_v33  ;;  %v1283_v50 = vld [vmem:[%s2099_s4] ss:$0 sm:$0xff] }
 0x340   : > { %v777_v53 = vmul.f32 1.442695, %v776_v52  ;;  %1382 = vmatprep.subr.bf16.mxu1 %v1670_v0 }
 0x342   : > { %1491 = vpow2.f32 %v777_v53 }
 0x343   : > { %1383 = vmatpush3.bf16.msra.mxu1 %v1484_v34 }
 0x344   : > { %v1490_v54 = vpop.eup %1489 }
 0x345   : > { %v669_v55 = vsel %vm505_vm2, %v1490_v54, 0.0  ;;  %v885_v58 = vpop.xlane.xlu1 %884 }
 0x346   : > { %670 = vadd.xlane.f32.xlu1 %v669_v55  ;;  %v886_v59 = vsub.f32 %v877_v38, %v885_v58 }
 0x348   : > { %v887_v60 = vmul.f32 1.442695, %v886_v59 }
 0x34a   : > { %1493 = vpow2.f32 %v887_v60 }
 0x34c   : > { %v1492_v56 = vpop.eup %1491 }
 0x34d   : > { %v779_v57 = vsel %vm505_vm2, %v1492_v56, 0.0 }
 0x34e   : > { %780 = vadd.xlane.f32.xlu0 %v779_v57 }
 0x354   : > { %v1494_v61 = vpop.eup %1493 }
 0x355   : > { %v889_v62 = vsel %vm505_vm2, %v1494_v61, 0.0 }
 0x357   : > { %675 = vrot.lane.b32.xlu1 %v1948_v10, %s1679_s27 }
 0x364   : > { %564 = vrot.lane.b32.xlu0 %v1948_v10, %s1680_s22  ;;  %s1296_s22 = sshll.u32 %s1768_s21, 7  ;;  %s1686_s21 = smov [#allocation8]  }
 0x368   : > { %895 = vrot.lane.b32.xlu0 %v1948_v10, %s1681_s23  ;;  %s430_s23 = scalar_lea.vmem [#allocation8], %s1267_s12  ;;  %s1597_s12 = sshll.u32 %s1686_s21, 4  ;;  %s1598_s12 = int_to_ptr.vmem [resolvable:$false] %s1597_s12 }
 0x369   : > { %s1599_s13 = scalar_lea.vmem %s1598_s12, 256 }
 0x37b   : > { %890 = vadd.xlane.f32.xlu1 %v889_v62 }
 0x38c   : > { %785 = vrot.lane.b32.xlu1 %v1948_v10, %s1682_s25  ;;  %s1170_s25 = sshll.u32 %s430_s23, 4  ;;  %s2052_s25 = int_to_ptr.vmem [resolvable:$true] %s1170_s25 }
 0x38d   : > { %s1593_s26 = scalar_lea.vmem %s2052_s25, 128  ;;  %p1600_p7 = scmp.lt.s32.totalorder %s2052_s25, %s1598_s12 }
 0x38e   : > { %p1594_p11 = scmp.ne.s32.totalorder %s2052_s25, %s1593_s26  ;;  %p1601_p9 = scmp.lt.s32.totalorder %s1599_s13, %s1593_s26 }
 0x390   : > { %p1595_p1 = pnand %p1594_p11, %p2130_p0  ;;  %p1602_p12 = por %p1601_p9, %p1600_p7 }
 0x392   : > { %p1596_p3 = pneg %p1595_p1 }
 0x394   : > { %p1603_p2 = pnand %p1602_p12, %p1596_p3 }
 0x3cb   : > { %v560_v63 = vpop.xlane.xlu0 %559 }
 0x3cc   : > { %1495 = vrcp.f32 %v560_v63  ;;  %v1485_v63 = vld [vmem:[%s2102_s7] sm:$0xff]  }
 0x3d3   : > { %v671_v1 = vpop.xlane.xlu1 %670 }
 0x3d4   : > { %1497 = vrcp.f32 %v671_v1 }
 0x3d6   : > { %v1496_v2 = vpop.eup %1495 }
 0x3d7   : > { %v562_v5 = vmul.f32 %v1496_v2, %v1488_v49  ;;  %v676_v8 = vpop.permute.xlu1 %675 }
 0x3d8   : > { %v681_v12 = vsel %vm569_vm3, %v676_v8, 0  ;;  %v1288_v8 = vld [vmem:[%s2101_s6] ss:$0 sm:$0xff] }
 0x3d9   : > { %v563_v9 = vpack.c.bf16 %v562_v5, %v562_v5 }
 0x3db   : > { %v781_v4 = vpop.xlane.xlu0 %780 }
 0x3dc   : > { %1499 = vrcp.f32 %v781_v4 }
 0x3de   : > { %v1498_v11 = vpop.eup %1497 }
 0x3df   : > { %v565_v6 = vpop.permute.xlu0 %564  ;;  %v673_v10 = vmul.f32 %v1498_v11, %v1490_v54 }
 0x3e0   : > { %v571_v7 = vsel %vm569_vm3, %v565_v6, 0  ;;  %v1287_v6 = vld [vmem:[%s2100_s5] ss:$0 sm:$0xff] }
 0x3e1   : > { %1339 = vmatpush3.bf16.msra.mxu0 %v571_v7  ;;  %v674_v13 = vpack.c.bf16 %v673_v10, %v673_v10 }
 0x3e2   : > { %1350 = vmatprep.subr.bf16.mxu0 %v1670_v0 }
 0x3e3   : > { %v896_v19 = vpop.permute.xlu0 %895 }
 0x3e4   : > { %1341 = vmatmul.mubr.msk.bf16.vlgmr.msra.gmra.mrb[4].mxu0 %vm505_vm2, %v563_v9  ;;  %v901_v21 = vsel %vm569_vm3, %v896_v19, 0 }
 0x3e5   : > { %1351 = vmatpush3.bf16.msra.mxu0 %v681_v12  ;;  %1352 = vmatprep.mubr.msk.bf16.mxu0 %vm1671_vm0, %v1670_v0  ;;  %v1289_v12 = vld [vmem:[%s2103_s8] ss:$0 sm:$0xff] }
 0x3e6   : > { %1362 = vmatprep.subr.bf16.mxu0 %v1670_v0  ;;  %v1500_v14 = vpop.eup %1499 }
 0x3e7   : > { %v783_v16 = vmul.f32 %v1500_v14, %v1492_v56 }
 0x3e9   : > { %v784_v20 = vpack.c.bf16 %v783_v16, %v783_v16 }
 0x3ec   : > { %1353 = vmatmul.mubr.msk.bf16.vlgmr.msra.gmra.mrb[8].mxu0 %vm505_vm2, %v674_v13 }
 0x3ed   : > { %1364 = vmatprep.mubr.msk.bf16.mxu0 %vm1671_vm0, %v1670_v0 }
 0x408   : > { %v891_v15 = vpop.xlane.xlu1 %890 }
 0x409   : > { %1501 = vrcp.f32 %v891_v15 }
 0x40c   : > { %v786_v17 = vpop.permute.xlu1 %785 }
 0x40d   : > { %v791_v18 = vsel %vm569_vm3, %v786_v17, 0 }
 0x40e   : > { %1363 = vmatpush3.bf16.msra.mxu0 %v791_v18 }
 0x40f   : > { %1374 = vmatprep.subr.bf16.mxu0 %v1670_v0 }
 0x411   : > { %1365 = vmatmul.mubr.msk.bf16.vlgmr.msra.gmra.mrb[12].mxu0 %vm505_vm2, %v784_v20 }
 0x412   : > { %1375 = vmatpush3.bf16.msra.mxu0 %v901_v21  ;;  %1376 = vmatprep.mubr.msk.bf16.mxu0 %vm1671_vm0, %v1670_v0 }
 0x413   : > { %v1502_v22 = vpop.eup %1501  ;;  %1388 = vmatprep.subr.bf16.mxu0 %v1670_v0 }
 0x414   : > { %v893_v23 = vmul.f32 %v1502_v22, %v1494_v61 }
 0x416   : > { %v894_v24 = vpack.c.bf16 %v893_v23, %v893_v23 }
 0x419   : > { %1377 = vmatmul.mubr.msk.bf16.vlgmr.msra.gmra.mrb[16].mxu0 %vm505_vm2, %v894_v24 }
 0x41a   : > { %1392 = vmatprep.mubr.msk.bf16.mxu0 %vm1671_vm0, %v1670_v0  ;;  %1389 = vmatpush3.bf16.msra.mxu0 %v1485_v63 }
 0x41b   : > { %1390 = vmatprep.subr.bf16.mxu0 %v1670_v0 }
 0x4b7   : > { %v607_v25 = vpop.f32.mrb[4].mxu0 }
 0x4b8   : > { %v1342_v26 = vpop.f32.mrb[5].mxu0 }
 0x4b9   : > { %v610_v27 = vpop.f32.mrb[6].mxu0 }
 0x4ba   : > { %v1343_v28 = vpop.f32.mrb[7].mxu0 }
 0x4bb   : > { %v1293_v28 = vld [vmem:[%s2104_s9] ss:$0 sm:$0xff] }
 0x4bf   : > { %v717_v29 = vpop.f32.mrb[8].mxu0 }
 0x4c0   : > { %944 = vrot.lane.b32.xlu1 %v717_v29, %s1683_s29  ;;  %v1354_v30 = vpop.f32.mrb[9].mxu0 }
 0x4c1   : > { %v720_v31 = vpop.f32.mrb[10].mxu0  ;;  %v1294_v30 = vld [vmem:[%s2105_s10] ss:$0 sm:$0xff] }
 0x4c2   : > { %v1355_v32 = vpop.f32.mrb[11].mxu0 }
 0x4e4   : > { %v827_v35 = vpop.f32.mrb[12].mxu0 }
 0x4e5   : > { %948 = vrot.lane.b32.xlu0 %v827_v35, %s1684_s11  ;;  %v1366_v36 = vpop.f32.mrb[13].mxu0 }
 0x4e6   : > { %v830_v37 = vpop.f32.mrb[14].mxu0 }
 0x4e7   : > { %v1367_v38 = vpop.f32.mrb[15].mxu0 }
 0x4ec   : > { %v937_v39 = vpop.f32.mrb[16].mxu0 }
 0x4ed   : > { %952 = vrot.lane.b32.xlu1 %v937_v39, %s1685_s17  ;;  %v1378_v40 = vpop.f32.mrb[17].mxu0  ;;  %s2128_s17 = sld [smem:[#allocation15_spill]] }
 0x4ee   : > { %v940_v41 = vpop.f32.mrb[18].mxu0 }
 0x4ef   : > { %v1379_v42 = vpop.f32.mrb[19].mxu0 }
 0x4f3   : > { %s2129_s28 = smov %s2128_s17  ;;  %s2050_s0 = scalar_lea.hbm %s2128_s17, %s1296_s22 }
 0x532   : > { %v945_v43 = vpop.permute.xlu1 %944 }
 0x533   : > { %v955_v45 = vsel %vm505_vm2, %v607_v25, %v945_v43 }
 0x557   : > { %v949_v44 = vpop.permute.xlu0 %948 }
 0x558   : > { %v957_v46 = vsel %vm956_vm4, %v955_v45, %v949_v44 }
 0x55f   : > { %v953_v47 = vpop.permute.xlu1 %952 }
 0x560   : > { %v959_v48 = vsel %vm958_vm5, %v957_v46, %v953_v47 }
 0x561   : > { %v960_v49 = vpack.c.bf16 %v959_v48, %v959_v48 }
 0x563   : > { %1385 = vmatmul.mubr.msk.bf16.vlgmr.msra.gmra.mrb[16].mxu1 %vm457_vm1, %v960_v49 }
 0x636   : > { %v1021_v51 = vpop.f32.mrb[16].mxu1 }
 0x637   : > { %v1022_v52 = vadd.f32 %v1283_v50, %v1021_v51  ;;  %v1386_v53 = vpop.f32.mrb[17].mxu1 }
 0x638   : > { %v1024_v54 = vpop.f32.mrb[18].mxu1 }
 0x639   : > { %v1387_v55 = vpop.f32.mrb[19].mxu1  ;;  %v1027_v56 = vadd.f32 %v1022_v52, %v1936_v3  ;;  %v1486_v3 = vld [vmem:[%s2102_s7 + $0x8] sm:$0xff]  }
 0x63a   : > { %1391 = vmatpush3.bf16.msra.mxu0 %v1486_v3 }
 0x63b   : > { %v1030_v57 = vsel %vm457_vm1, %v1027_v56, 0.0 }
 0x63c   : > { %1031 = vadd.xlane.f32.xlu0 %v1030_v57 }
 0x6c9   : > { %v1032_v58 = vpop.xlane.xlu0 %1031 }
 0x6ca   : > { %v1034_v59 = vmul.f32 0.03125, %v1032_v58 }
 0x6cc   : > { %v1035_v60 = vsub.f32 %v1027_v56, %v1034_v59 }
 0x6ce   : > { %v1036_v61 = vmul.f32 %v1035_v60, %v1035_v60 }
 0x6d0   : > { %v1037_v62 = vsel %vm457_vm1, %v1036_v61, 0.0 }
 0x6d1   : > { %1038 = vadd.xlane.f32.xlu1 %v1037_v62 }
 0x75e   : > { %v1039_v1 = vpop.xlane.xlu1 %1038 }
 0x75f   : > { %v1040_v2 = vmul.f32 0.03125, %v1039_v1 }
 0x761   : > { %v1041_v4 = vadd.f32 1e-05, %v1040_v2 }
 0x763   : > { %1503 = vrsqrt.f32 %v1041_v4 }
 0x76d   : > { %v1504_v5 = vpop.eup %1503 }
 0x76e   : > { %v1043_v7 = vmul.f32 %v1504_v5, %v1035_v60 }
 0x770   : > { %v1050_v0 = vmul.f32 %v1287_v6, %v1043_v7 }
 0x772   : > { %v1057_v9 = vadd.f32 %v1288_v8, %v1050_v0 }
 0x774   : > { %v1058_v11 = vpack.c.bf16 %v1057_v9, %v1057_v9 }
 0x776   : > { %1393 = vmatmul.mubr.msk.bf16.vlgmr.msra.gmra.mrb[20].mxu0 %vm457_vm1, %v1058_v11 }
 0x849   : > { %v1119_v10 = vpop.f32.mrb[20].mxu0 }
 0x84a   : > { %v1120_v13 = vadd.f32 %v1289_v12, %v1119_v10  ;;  %v1394_v14 = vpop.f32.mrb[21].mxu0 }
 0x84b   : > { %v1122_v15 = vpop.f32.mrb[22].mxu0 }
 0x84c   : > { %v1395_v16 = vpop.f32.mrb[23].mxu0  ;;  %v1125_v17 = vadd.f32 %v1120_v13, %v1057_v9 }
 0x84e   : > { %v1128_v18 = vsel %vm457_vm1, %v1125_v17, 0.0 }
 0x84f   : > { %1129 = vadd.xlane.f32.xlu0 %v1128_v18 }
 0x8dc   : > { %v1130_v19 = vpop.xlane.xlu0 %1129 }
 0x8dd   : > { %v1131_v20 = vmul.f32 0.03125, %v1130_v19 }
 0x8df   : > { %v1132_v21 = vsub.f32 %v1125_v17, %v1131_v20 }
 0x8e1   : > { %v1133_v22 = vmul.f32 %v1132_v21, %v1132_v21 }
 0x8e3   : > { %v1134_v23 = vsel %vm457_vm1, %v1133_v22, 0.0 }
 0x8e4   : > { %1135 = vadd.xlane.f32.xlu0 %v1134_v23 }
 0x971   : > { %v1136_v24 = vpop.xlane.xlu0 %1135 }
 0x972   : > { %v1137_v25 = vmul.f32 0.03125, %v1136_v24 }
 0x974   : > { %v1138_v26 = vadd.f32 1e-05, %v1137_v25 }
 0x976   : > { %1505 = vrsqrt.f32 %v1138_v26 }
 0x980   : > { %v1506_v27 = vpop.eup %1505 }
 0x981   : > { %v1140_v29 = vmul.f32 %v1506_v27, %v1132_v21 }
 0x983   : > { %v1147_v31 = vmul.f32 %v1293_v28, %v1140_v29 }
 0x985   : > { %v1154_v32 = vadd.f32 %v1294_v30, %v1147_v31 }
 0x987   : > { %1155 = vst.msk [vmem:[%s430_s23] sm:$0xff] %vm457_vm1, %v1154_v32 }
 0x988   : > { %1606 = shalt.err (!%p1603_p2)
}
 0x989   : > { %s1607_s14 = scalar_lea.hbm %s2050_s0, 128  ;;  %s1611_s23 = scalar_lea.hbm %s2129_s28, 256 }
 0x98a   : > { %p1608_p13 = scmp.ne.s32.totalorder %s2050_s0, %s1607_s14  ;;  %p1612_p4 = scmp.lt.u32.totalorder %s2050_s0, %s2129_s28 }
 0x98b   : > { %p1613_p5 = scmp.lt.u32.totalorder %s1611_s23, %s1607_s14  ;;  %p1615_p11 = scmp.lt.u32.totalorder %s1607_s14, %s2050_s0 }
 0x98c   : > { %p1609_p6 = pnand %p1608_p13, %p2130_p0 }
 0x98d   : > { %p1614_p8 = por %p1613_p5, %p1612_p4 }
 0x98e   : > { %p1610_p10 = pneg %p1609_p6 }
 0x98f   : > { %p1616_p1 = por %p1615_p11, %p1614_p8 }
 0x991   : > { %p1617_p3 = pnand %p1616_p1, %p1610_p10 }
 0x993   : > { %1620 = shalt.err (!%p1617_p3)
}
 0x994   : > { %1406 = dma.vmem_to_hbm [thread:$0]  (%p2130_p0), %s2052_s25, 128, %s2050_s0, %s1157_s30  }
 0x995 PF: > { %s2131_s17 = sld [smem:[#allocation12_spill]]  ;;  %s2132_s26 = sld [smem:[#allocation13_spill]] }
 0x996   : > { %p2134_p9 = scmp.ge.s32.totalorder %s1663_s20, 2 }
 0x99b   : > { %s1182_s21 = sand.u32 1, %s2131_s17   ;;  %p2133_p7 = scmp.ne.s32.totalorder %s2132_s26, 0 }
 0x99c   : > { %s1183_s12 = scalar_lea.sflag [#allocation4], %s1182_s21 }
 0x99d   : > { %p1420_p12 = pnand %p2134_p9, %p2133_p7 }
 0x99f   : > { %1646 = dma.done.wait (!%p1420_p12), %s1183_s12, 128  }
 0x9a0   : > { %1648 = vsyncadd (!%p1420_p12), %s1183_s12, 4294967168  ;;  %p25_p2 = scmp.ge.s32.totalorder %s1857_s24, 4   ;;  %s2135_s17 = smov %s1655_s18 }
 0x9a1   : > { %s2136_s18 = smov %s1659_s19  ;;  %s2137_s19 = smov %s1873_s16 }
 0x9a2   : > { %s2138_s20 = smov %s1857_s24  ;;  %27 = sbr.rel (!%p25_p2) target bundleno = 9 (0x9), region = 117 }
 0x9a9   :  { %1188 = vsyncpa [#allocation3], 1 }
 0x9aa   :  { %1190 = vsyncpa [#allocation3 + $0x1], 1 }
 0x9ab   :  { %1191 = vsyncpa [#allocation6], 1 }
 0x9ac   :  { %1192 = vsyncpa [#allocation4], 1 }
 0x9ad   :  { %1194 = vsyncpa [#allocation4 + $0x1], 1 }

</bundles_post_ra>
